<compile_context>
chip_gen: v7x
topology: tpu7x:2x2x1
jax: 0.10.0
libtpu: 0.0.40
codegen_flags: <defaults>
</compile_context>

<pallas_src>
import functools

import jax
import jax.numpy as jnp
from jax.experimental import pallas as pl
from jax.experimental.pallas import tpu as pltpu


def _ts_min_kernel(x_ref, o_ref, *, starts, window, span):
    # x_ref: (Bblk, T, F) VMEM tile, o_ref: (Bblk, S, F) output tile
    x = x_ref[...]

    # Shifted elementwise-min accumulation over the full (Bblk, span, F) slab.
    # window-1 VPU minima, no per-window XLU reductions, no jnp.stack.
    acc = x[:, 0:span, :]
    for k in range(1, window):
        acc = jnp.minimum(acc, x[:, k:k + span, :])

    if starts == tuple(range(span)):
        # stride == 1: every start is needed -> one dense full-tile store.
        o_ref[...] = acc
    else:
        # stride > 1 (including the appended tail window T - window):
        # statically select the required start rows from the dense slab.
        pieces = [acc[:, s:s + 1, :] for s in starts]
        o_ref[...] = jnp.concatenate(pieces, axis=1)


def _choose_block_batch(B, T, F, S, itemsize, budget_bytes=8 * 1024 * 1024):
    """Pick how many batch elements to process per grid step."""
    per_batch = (T + S) * F * itemsize          # input + output rows per element
    divisors = [d for d in range(1, B + 1) if B % d == 0]
    # largest divisor whose double-buffered tiles fit the per-buffer budget
    fitting = [d for d in divisors if 2 * d * per_batch <= budget_bytes] or [1]
    bblk = max(fitting)
    # keep >= 2 grid steps when possible so v7x's two TensorCores both get work
    if B // bblk < 2:
        smaller = [d for d in fitting if B // d >= 2]
        if smaller:
            bblk = max(smaller)
    return bblk


def ts_min_forward(x, window=5, strides=1):
    """Pallas TPU implementation of the ts_min module forward pass.

    x: (B, T, F) array. Returns (B, F, S), where S is the number of sliding
    windows (identical to the PyTorch module's iter_list length).
    """
    B, T, F = x.shape
    span = T - window + 1
    starts = list(range(0, span, strides))
    if (T - window) not in starts:
        starts.append(T - window)
    S = len(starts)

    bblk = _choose_block_batch(B, T, F, S, x.dtype.itemsize)

    kernel = functools.partial(
        _ts_min_kernel, starts=tuple(starts), window=window, span=span)

    out = pl.pallas_call(
        kernel,
        out_shape=jax.ShapeDtypeStruct((B, S, F), x.dtype),
        grid=(B // bblk,),
        in_specs=[pl.BlockSpec((bblk, T, F), lambda b: (b, 0, 0))],
        out_specs=pl.BlockSpec((bblk, S, F), lambda b: (b, 0, 0)),
        compiler_params=pltpu.CompilerParams(
            dimension_semantics=("parallel",),
            vmem_limit_bytes=32 * 1024 * 1024),
    )(x)

    # Spec parity with torch: output.transpose(1, 2) -> (B, F, S).  This is
    # layout glue outside the kernel's roofline; drop it if the downstream
    # consumer can accept (B, S, F) directly.
    return jnp.transpose(out, (0, 2, 1))


def _reference(x, window=5, strides=1):
    B, T, F = x.shape
    starts = list(range(0, T - window + 1, strides))
    if (T - window) not in starts:
        starts.append(T - window)
    windows = [jnp.min(x[:, s:s + window, :], axis=1) for s in starts]
    out = jnp.stack(windows, axis=1)            # (B, S, F)
    return jnp.transpose(out, (0, 2, 1))        # (B, F, S)


if __name__ == "__main__":
    key = jax.random.PRNGKey(0)
    B, T, F = 2, 8, 32          # batch=2, seq=8, hidden=32

    x = jax.random.normal(key, (B, T, F), dtype=jnp.float32)

    # Default module config (window=5, stride=1).
    y = jax.block_until_ready(ts_min_forward(x, window=5, strides=1))
    y_ref = _reference(x, window=5, strides=1)
    assert y.shape == y_ref.shape, (y.shape, y_ref.shape)
    assert jnp.allclose(y, y_ref), "mismatch vs reference (stride=1)"

    # stride=2 exercises the appended tail-window path (T - window not on the
    # stride grid), a correctness concern flagged in review.
    y2 = jax.block_until_ready(ts_min_forward(x, window=5, strides=2))
    y2_ref = _reference(x, window=5, strides=2)
    assert y2.shape == y2_ref.shape, (y2.shape, y2_ref.shape)
    assert jnp.allclose(y2, y2_ref), "mismatch vs reference (stride=2)"

    print("KERNEL_OK")
</pallas_src>

<mosaic_0001>
module attributes {stable_mosaic.version = 11 : i64} {
  func.func @_ts_min_kernel(%arg0: i32, %arg1: memref<1x8x32xf32, #tpu.memory_space<vmem>>, %arg2: memref<1x4x32xf32, #tpu.memory_space<vmem>>) attributes {dimension_semantics = [#tpu.dimension_semantics<parallel>], iteration_bounds = array<i64: 2>, scalar_prefetch = 0 : i64, scratch_operands = 0 : i64, tpu.core_type = #tpu.core_type<tc>, window_params = [{transform_indices = @transform_0, window_bounds = array<i64: 1, 8, 32>}, {transform_indices = @transform_1, window_bounds = array<i64: 1, 4, 32>}]} {
    %c0 = arith.constant 0 : index
    %c0_0 = arith.constant 0 : index
    %c0_1 = arith.constant 0 : index
    %0 = vector.load %arg1[%c0, %c0_0, %c0_1] : memref<1x8x32xf32, #tpu.memory_space<vmem>>, vector<1x8x32xf32>
    %1 = vector.extract_strided_slice %0 {offsets = [0, 0, 0], sizes = [1, 4, 32], strides = [1, 1, 1]} : vector<1x8x32xf32> to vector<1x4x32xf32>
    %2 = vector.extract_strided_slice %0 {offsets = [0, 1, 0], sizes = [1, 4, 32], strides = [1, 1, 1]} : vector<1x8x32xf32> to vector<1x4x32xf32>
    %3 = arith.minimumf %1, %2 : vector<1x4x32xf32>
    %4 = vector.extract_strided_slice %0 {offsets = [0, 2, 0], sizes = [1, 4, 32], strides = [1, 1, 1]} : vector<1x8x32xf32> to vector<1x4x32xf32>
    %5 = arith.minimumf %3, %4 : vector<1x4x32xf32>
    %6 = vector.extract_strided_slice %0 {offsets = [0, 3, 0], sizes = [1, 4, 32], strides = [1, 1, 1]} : vector<1x8x32xf32> to vector<1x4x32xf32>
    %7 = arith.minimumf %5, %6 : vector<1x4x32xf32>
    %8 = vector.extract_strided_slice %0 {offsets = [0, 4, 0], sizes = [1, 4, 32], strides = [1, 1, 1]} : vector<1x8x32xf32> to vector<1x4x32xf32>
    %9 = arith.minimumf %7, %8 : vector<1x4x32xf32>
    %c0_2 = arith.constant 0 : index
    %c0_3 = arith.constant 0 : index
    %c0_4 = arith.constant 0 : index
    %10 = vector.load %arg2[%c0_2, %c0_3, %c0_4] : memref<1x4x32xf32, #tpu.memory_space<vmem>>, vector<1x4x32xf32>
    tpu.vector_store %arg2[%c0_2, %c0_3, %c0_4], %9 {strides = array<i32>} : memref<1x4x32xf32, #tpu.memory_space<vmem>>, vector<1x4x32xf32>,
    return
  }
  func.func @transform_0(%arg0: i32) -> (i32, i32, i32) {
    %c0_i32 = arith.constant 0 : i32
    %c0_i32_0 = arith.constant 0 : i32
    %c0_i32_1 = arith.constant 0 : i32
    return %arg0, %c0_i32, %c0_i32_0 : i32, i32, i32
  }
  func.func @transform_1(%arg0: i32) -> (i32, i32, i32) {
    %c0_i32 = arith.constant 0 : i32
    %c0_i32_0 = arith.constant 0 : i32
    %c0_i32_1 = arith.constant 0 : i32
    return %arg0, %c0_i32, %c0_i32_0 : i32, i32, i32
  }
}

</mosaic_0001>

<bundles_post_ra>
// kernel: tpu_custom_call.1
= control target key start
LH: loop header
LB: loop body
LE: loop exit
PB: predicated region body
PF: predicated region fallthrough
CT: control target
= control target key end

     0   :  { %6 = vsyncpa [#allocation3], 0  ;;  %s562_s0 = inlined_call_operand.hbm [shape: f32[2,8,32], index: 0, kind: input, shape index: {}]   ;;  %s563_s1 = inlined_call_operand.hbm [shape: f32[2,4,32], index: 1, kind: output, shape index: {}]  }
   0x1   :  { %8 = vsyncpa [#allocation3 + $0x1], 0 }
   0x2   :  { %9 = vsyncpa [#allocation4], 0 }
   0x3   :  { %11 = vsyncpa [#allocation4 + $0x1], 0  ;;  %s400_s6 = smov 0   ;;  %s402_s7 = smov 0  }
   0x4   :  { %s404_s8 = smov 0   ;;  %s406_s9 = smov 0  }
   0x5 LB: > { %s421_s10 = sadd.s32 4294967295, %s386_s9   ;;  %s232_s11 = sadd.s32 4294967294, %s386_s9   ;;  %s386_s9 = sphi %s406_s9, %s578_s9   ;;  %s382_s8 = sphi %s404_s8, %s577_s8   ;;  %s378_s7 = sphi %s402_s7, %s576_s7   ;;  %s374_s6 = sphi %s400_s6, %s575_s6  }
   0x6   : > { %s425_s12 = sadd.s32 1, %s386_s9   ;;  %s24_s13 = sadd.s32 1, %s382_s8 }
   0x7   : > { %s21_s14 = ssub.s32 %s386_s9, %s425_s12  ;;  %p31_p0 = scmp.ne.s32.totalorder %s382_s8, %s378_s7 }
   0x8   : > { %p22_p1 = scmp.eq.s32.totalorder %s21_s14, 0  ;;  %p32_p2 = scmp.eq.s32.totalorder %s386_s9, 0 }
   0x9   : > { %p37_p3 = scmp.ne.s32.totalorder %s378_s7, %s374_s6  ;;  %p38_p4 = scmp.eq.s32.totalorder %s421_s10, 0 }
   0xa   : > { %s437_s15 = scalar_select %p22_p1, %s382_s8, %s24_s13  }
   0xb   : > { %p439_p5 = por %p32_p2, %p31_p0  ;;  %p443_p6 = por %p38_p4, %p37_p3 }
   0xc   : > { %p61_p7 = scmp.eq.s32.totalorder %s421_s10, 1  ;;  %p67_p8 = scmp.eq.s32.totalorder %s232_s11, 1 }
   0xd   : > { %p256_p10 = scmp.lt.s32.totalorder %s386_s9, 2  ;;  %s87_s20 = sand.u32 1, %s382_s8  }
   0xe   : > { %p450_p11 = por %p61_p7, %p31_p0  ;;  %p454_p12 = por %p67_p8, %p37_p3 }
   0xf   : > { %s236_s21 = sshll.u32 %s386_s9, 7  ;;  %s235_s22 = sshll.u32 %s87_s20, 3 }
  0x10   : > { %s567_s18 = scalar_select %p450_p11, 1, 0 }
  0x11   : > { %s568_s19 = scalar_select %p454_p12, 1, 0 }
  0x12   : > { %s463_s25 = scalar_lea.hbm %s562_s0, %s236_s21  ;;  %s91_s26 = scalar_lea.vmem [#allocation2], %s235_s22 }
  0x13   : > { %s98_s27 = sshll.u32 %s91_s26, 4  ;;  %p467_p13 = pnand %p256_p10, %p439_p5  ;;  %s471_s27 = int_to_ptr.vmem [resolvable:$true] %s98_s27 }
  0x14   : > { %s88_s29 = scalar_lea.sflag [#allocation3], %s87_s20  ;;  %s290_s30 = scalar_lea.hbm %s463_s25, 128 }
  0x15   : > { %p291_p2 = scmp.ne.s32.totalorder %s463_s25, %s290_s30  ;;  %p292_p3 = pneg %p467_p13 }
  0x16   : > { %s295_s4 = scalar_lea.hbm %s562_s0, 256  ;;  %p296_p5 = scmp.lt.u32.totalorder %s463_s25, %s562_s0 }
  0x17   : > { %p293_p4 = pnand %p292_p3, %p291_p2  ;;  %p297_p8 = scmp.lt.u32.totalorder %s295_s4, %s290_s30 }
  0x18   : > { %p299_p9 = scmp.lt.u32.totalorder %s290_s30, %s463_s25 }
  0x19   : > { %p294_p7 = pneg %p293_p4  ;;  %p298_p10 = por %p297_p8, %p296_p5 }
  0x1b   : > { %p300_p0 = por %p299_p9, %p298_p10 }
  0x1d   : > { %p301_p1 = pnand %p300_p0, %p294_p7 }
  0x1f   : > { %304 = shalt.err (!%p301_p1)
}
  0x20   : > { %s305_s13 = scalar_lea.vmem %s471_s27, 128  ;;  %s388_s14 = smov [#allocation2]  }
  0x21   : > { %p306_p2 = scmp.ne.s32.totalorder %s471_s27, %s305_s13  ;;  %s310_s16 = sshll.u32 %s388_s14, 4  ;;  %s311_s16 = int_to_ptr.vmem [resolvable:$false] %s310_s16 }
  0x22   : > { %s312_s20 = scalar_lea.vmem %s311_s16, 256  ;;  %p313_p11 = scmp.lt.s32.totalorder %s471_s27, %s311_s16 }
  0x23   : > { %p308_p4 = pnand %p306_p2, %p292_p3  ;;  %p314_p5 = scmp.lt.s32.totalorder %s312_s20, %s305_s13 }
  0x25   : > { %p309_p12 = pneg %p308_p4  ;;  %p315_p8 = por %p314_p5, %p313_p11 }
  0x27   : > { %p316_p9 = pnand %p315_p8, %p309_p12 }
  0x29   : > { %319 = shalt.err (!%p316_p9)
}
  0x2a   : > { %251 = dma.hbm_to_vmem [thread:$0]  (!%p467_p13), %s463_s25, 128, %s471_s27, %s88_s29  }
  0x2b   : > { %p570_p0 = scmp.lt.s32.totalorder %s386_s9, 3  ;;  %p571_p1 = scmp.ge.s32.totalorder %s386_s9, 1 }
  0x2d   : > { %p104_p3 = pnand %p571_p1, %p570_p0 }
  0x2e   : > { %s505_s21 = sand.u32 (!%p104_p3), 1, %s378_s7  }
  0x2f   : > { %107 = sbr.rel (%p104_p3) target bundleno = 81 (0x51), region = 24  ;;  %s238_s22 = sshll.u32 (!%p104_p3), %s505_s21, 3 }
  0x30   : > { %s110_s23 = scalar_lea.sflag (!%p104_p3), [#allocation3], %s505_s21  ;;  %s113_s24 = scalar_lea.vmem (!%p104_p3), [#allocation2], %s238_s22 }
  0x36   : > { %365 = dma.done.wait (%p443_p6), %s110_s23, 128  }
  0x37   : > { %367 = vsyncadd (%p443_p6), %s110_s23, 4294967168  ;;  %v132_v0 = vld [vmem:[%s113_s24] sm:$0xff]  ;;  %s239_s25 = sshll.u32 %s505_s21, 2  ;;  %s241_s28 = sshll.u32 %s421_s10, 6  ;;  %vm146_vm0 = vcmask 257024  }
  0x38   : > { %v134_v1 = vrot.slane %v132_v0, 1  ;;  %v137_v2 = vrot.slane %v132_v0, 2  ;;  %v140_v4 = vrot.slane %v132_v0, 3  ;;  %v143_v6 = vrot.slane %v132_v0, 4  ;;  %s131_s26 = scalar_lea.vmem [#allocation5], %s239_s25  ;;  %s520_s30 = scalar_lea.hbm %s563_s1, %s241_s28 }
  0x39   : > { %s162_s27 = sshll.u32 %s131_s26, 4  ;;  %s149_s2 = scalar_lea.sflag [#allocation4], %s505_s21  ;;  %s515_s27 = int_to_ptr.vmem [resolvable:$true] %s162_s27 }
  0x3a   : > { %v136_v3 = vmin.f32 %v132_v0, %v134_v1  ;;  %s320_s3 = scalar_lea.vmem %s515_s27, 64  ;;  %p572_p11 = scmp.ne.s32.totalorder %s567_s18, 0 }
  0x3b   : > { %p321_p6 = scmp.ne.s32.totalorder %s515_s27, %s320_s3  ;;  %s389_s10 = smov [#allocation5]  }
  0x3c   : > { %v139_v5 = vmin.f32 %v136_v3, %v137_v2  ;;  %s324_s4 = sshll.u32 %s389_s10, 4  ;;  %s325_s4 = int_to_ptr.vmem [resolvable:$false] %s324_s4 }
  0x3d   : > { %p322_p12 = pnand %p321_p6, %p572_p11  ;;  %s326_s5 = scalar_lea.vmem %s325_s4, 128 }
  0x3e   : > { %v142_v7 = vmin.f32 %v139_v5, %v140_v4  ;;  %p327_p7 = scmp.lt.s32.totalorder %s515_s27, %s325_s4  ;;  %p328_p10 = scmp.lt.s32.totalorder %s326_s5, %s320_s3 }
  0x3f   : > { %p323_p13 = pneg %p322_p12 }
  0x40   : > { %v145_v8 = vmin.f32 %v142_v7, %v143_v6  ;;  %p329_p2 = por %p328_p10, %p327_p7 }
  0x42   : > { %147 = vst.msk [vmem:[%s131_s26] sm:$0xf] %vm146_vm0, %v145_v8  ;;  %p330_p4 = pnand %p329_p2, %p323_p13 }
  0x44   : > { %333 = shalt.err (!%p330_p4)
}
  0x45   : > { %s334_s11 = scalar_lea.hbm %s520_s30, 64  ;;  %s338_s16 = scalar_lea.hbm %s563_s1, 128 }
  0x46   : > { %p335_p5 = scmp.ne.s32.totalorder %s520_s30, %s334_s11  ;;  %p339_p0 = scmp.lt.u32.totalorder %s520_s30, %s563_s1 }
  0x47   : > { %p340_p1 = scmp.lt.u32.totalorder %s338_s16, %s334_s11  ;;  %p342_p6 = scmp.lt.u32.totalorder %s334_s11, %s520_s30 }
  0x48   : > { %p336_p8 = pnand %p335_p5, %p572_p11 }
  0x49   : > { %p341_p3 = por %p340_p1, %p339_p0 }
  0x4a   : > { %p337_p9 = pneg %p336_p8 }
  0x4b   : > { %p343_p12 = por %p342_p6, %p341_p3 }
  0x4d   : > { %p344_p13 = pnand %p343_p12, %p337_p9 }
  0x4f   : > { %347 = shalt.err (!%p344_p13)
}
  0x50   : > { %246 = dma.vmem_to_hbm [thread:$0]  (%p572_p11), %s515_s27, 64, %s520_s30, %s149_s2  }
  0x51 PF: > { %s174_s22 = sand.u32 1, %s374_s6   ;;  %p573_p7 = scmp.ne.s32.totalorder %s568_s19, 0 }
  0x52   : > { %p574_p10 = scmp.ge.s32.totalorder %s386_s9, 2  ;;  %s175_s23 = scalar_lea.sflag [#allocation4], %s174_s22 }
  0x54   : > { %p253_p2 = pnand %p574_p10, %p573_p7 }
  0x56   : > { %369 = dma.done.wait (!%p253_p2), %s175_s23, 64  }
  0x57   : > { %371 = vsyncadd (!%p253_p2), %s175_s23, 4294967232  ;;  %p14_p4 = scmp.ge.s32.totalorder %s425_s12, 4   ;;  %s575_s6 = smov %s378_s7 }
  0x58   : > { %s576_s7 = smov %s382_s8  ;;  %s577_s8 = smov %s437_s15 }
  0x59   : > { %s578_s9 = smov %s425_s12  ;;  %16 = sbr.rel (!%p14_p4) target bundleno = 5 (0x5), region = 69 }
  0x60   :  { %180 = vsyncpa [#allocation3], 1 }
  0x61   :  { %182 = vsyncpa [#allocation3 + $0x1], 1 }
  0x62   :  { %183 = vsyncpa [#allocation4], 1 }
  0x63   :  { %185 = vsyncpa [#allocation4 + $0x1], 1 }

</bundles_post_ra>
